<compile_context>
chip_gen: v7x
topology: tpu7x:2x2x1
jax: 0.10.0
libtpu: 0.0.40
codegen_flags: <defaults>
</compile_context>

<pallas_src>
import functools

import jax
import jax.numpy as jnp
from jax.experimental import pallas as pl
from jax.experimental.pallas import tpu as pltpu


def _round_up(x, m):
    return ((x + m - 1) // m) * m


def _mlp_kernel(x_ref, w1_ref, b1_ref, w2_ref, b2_ref, w3_ref, b3_ref, o_ref):
    """One (n, hw-tile) block of the transposed 3-layer MLP.

    Block shapes:
      x_ref : (1, TC, tile)           w1_ref: (hidden_p, TC)
      o_ref : (1, out_dim, tile)      w2_ref: (hidden_p, hidden_p)
      b1/b2 : (hidden_p, 1)           w3_ref: (out_p, hidden_p)
      b3    : (out_p, 1)
    """
    x = x_ref[0]                                                 # (TC, tile)

    # Layer 1: (hidden_p, TC) @ (TC, tile) -> (hidden_p, tile), f32 accumulate.
    h1 = jnp.dot(w1_ref[...], x, preferred_element_type=jnp.float32)
    h1 = jnp.maximum(h1 + b1_ref[...], 0.0)                      # bias+ReLU in f32

    # Layer 2.
    h2 = jnp.dot(w2_ref[...], h1.astype(w2_ref.dtype),
                 preferred_element_type=jnp.float32)
    h2 = jnp.maximum(h2 + b2_ref[...], 0.0)

    # Layer 3 (no activation). Compute padded rows (dense MXU tile), store only
    # the true out_dim rows -> lane-dense, minimal HBM writeback.
    out = jnp.dot(w3_ref[...], h2.astype(w3_ref.dtype),
                  preferred_element_type=jnp.float32)
    out = out + b3_ref[...]
    out_dim = o_ref.shape[1]
    o_ref[0] = out[:out_dim].astype(o_ref.dtype)


def _pick_tile(HW, hw_tile):
    """Largest lane tile <= hw_tile that keeps layout legal; prefer exact divisors
    of HW (avoids a host-side pad copy of x)."""
    if HW <= hw_tile:
        return HW                              # single tile == full extent
    cap = max(128, (hw_tile // 128) * 128)
    t = cap
    while t >= 128:
        if HW % t == 0:
            return t                           # no padding needed
        t -= 128
    return cap                                 # fall back to padding


@functools.partial(jax.jit, static_argnames=("hw_tile", "compute_dtype"))
def mlp_model_forward(x, params, hw_tile=512, compute_dtype=jnp.float32):
    """x: (N, T, C, H, W) float32. params: dict of MLP weights/biases."""
    N, T, C, H, W = x.shape
    TC = T * C
    HW = H * W

    w1, b1 = params["w1"], params["b1"]        # (TC, hidden), (hidden,)
    w2, b2 = params["w2"], params["b2"]        # (hidden, hidden), (hidden,)
    w3, b3 = params["w3"], params["b3"]        # (hidden, out_dim), (out_dim,)
    hidden = w1.shape[1]
    out_dim = w3.shape[1]

    # Pad hidden/out_dim (weights only) to sublane multiples; zeros keep the
    # math exact. Output array itself stays at the true out_dim.
    hidden_p = _round_up(hidden, 8)
    out_p = _round_up(out_dim, 8)

    def pad2(a, rows, cols):
        return jnp.pad(a, ((0, rows - a.shape[0]), (0, cols - a.shape[1])))

    # Transposed weights (done once, tiny); biases as column vectors.
    w1t = pad2(w1.T, hidden_p, TC).astype(compute_dtype)          # (hidden_p, TC)
    w2t = pad2(w2.T, hidden_p, hidden_p).astype(compute_dtype)    # (hidden_p, hidden_p)
    w3t = pad2(w3.T, out_p, hidden_p).astype(compute_dtype)       # (out_p, hidden_p)
    b1c = pad2(b1.reshape(-1, 1), hidden_p, 1).astype(jnp.float32)
    b2c = pad2(b2.reshape(-1, 1), hidden_p, 1).astype(jnp.float32)
    b3c = pad2(b3.reshape(-1, 1), out_p, 1).astype(jnp.float32)

    # Input: contiguous reshape only (no transpose, no extra HBM copy of x).
    x_r = x.reshape(N, TC, HW).astype(compute_dtype)

    # Lane-axis tiling over HW.
    tile = _pick_tile(HW, hw_tile)
    HW_pad = _round_up(HW, tile)
    if HW_pad != HW:
        x_r = jnp.pad(x_r, ((0, 0), (0, 0), (0, HW_pad - HW)))

    grid = (N, HW_pad // tile)

    itemsize = jnp.dtype(compute_dtype).itemsize
    flops = 2 * N * HW_pad * (TC * hidden_p + hidden_p * hidden_p + hidden_p * out_p)
    bytes_accessed = (
        N * TC * HW_pad * itemsize
        + (w1t.size + w2t.size + w3t.size) * itemsize
        + (b1c.size + b2c.size + b3c.size) * 4
        + N * out_dim * HW_pad * 4
    )

    out_3d = pl.pallas_call(
        _mlp_kernel,
        out_shape=jax.ShapeDtypeStruct((N, out_dim, HW_pad), jnp.float32),
        grid_spec=pltpu.PrefetchScalarGridSpec(
            num_scalar_prefetch=0,
            grid=grid,
            in_specs=[
                pl.BlockSpec((1, TC, tile), lambda n, i: (n, 0, i)),       # x view
                pl.BlockSpec((hidden_p, TC), lambda n, i: (0, 0)),         # w1^T
                pl.BlockSpec((hidden_p, 1), lambda n, i: (0, 0)),          # b1
                pl.BlockSpec((hidden_p, hidden_p), lambda n, i: (0, 0)),   # w2^T
                pl.BlockSpec((hidden_p, 1), lambda n, i: (0, 0)),          # b2
                pl.BlockSpec((out_p, hidden_p), lambda n, i: (0, 0)),      # w3^T
                pl.BlockSpec((out_p, 1), lambda n, i: (0, 0)),             # b3
            ],
            out_specs=pl.BlockSpec((1, out_dim, tile), lambda n, i: (n, 0, i)),
        ),
        compiler_params=pltpu.CompilerParams(
            dimension_semantics=("parallel", "parallel"),
        ),
        cost_estimate=pl.CostEstimate(
            flops=flops, transcendentals=0, bytes_accessed=bytes_accessed),
    )(x_r, w1t, b1c, w2t, b2c, w3t, b3c)

    # Drop the (possible) HW padding; result is already (N, out_dim, H*W).
    out = out_3d[:, :, :HW].reshape(N, out_dim, H, W)
    return out


def init_params(key, in_dim, hidden_dim, out_dim):
    """Deterministic synthetic init (Linear layers: weight + bias)."""
    k1, k2, k3, k4, k5, k6 = jax.random.split(key, 6)
    s1 = 1.0 / jnp.sqrt(in_dim)
    s2 = 1.0 / jnp.sqrt(hidden_dim)
    return {
        "w1": jax.random.uniform(k1, (in_dim, hidden_dim), jnp.float32, -s1, s1),
        "b1": jax.random.uniform(k2, (hidden_dim,), jnp.float32, -s1, s1),
        "w2": jax.random.uniform(k3, (hidden_dim, hidden_dim), jnp.float32, -s2, s2),
        "b2": jax.random.uniform(k4, (hidden_dim,), jnp.float32, -s2, s2),
        "w3": jax.random.uniform(k5, (hidden_dim, out_dim), jnp.float32, -s2, s2),
        "b3": jax.random.uniform(k6, (out_dim,), jnp.float32, -s2, s2),
    }


def _reference(x, params):
    N, T, C, H, W = x.shape
    xf = jnp.transpose(x, (0, 3, 4, 1, 2)).reshape(-1, T * C)
    h1 = jnp.maximum(xf @ params["w1"] + params["b1"], 0.0)
    h2 = jnp.maximum(h1 @ params["w2"] + params["b2"], 0.0)
    of = h2 @ params["w3"] + params["b3"]
    return of.reshape(N, H, W, -1).transpose(0, 3, 1, 2)


if __name__ == "__main__":
    key = jax.random.PRNGKey(0)
    kx, kp = jax.random.split(key)

    # Small shapes: N=2, T=4, C=2, H=8, W=8  =>  in_dim = T*C = 8, HW = 64.
    N, T, C, H, W = 2, 4, 2, 8, 8
    hidden_dim, out_dim = 32, 1

    x = jax.random.normal(kx, (N, T, C, H, W), dtype=jnp.float32)
    params = init_params(kp, T * C, hidden_dim, out_dim)

    # f32 path (correctness check against pure-JAX reference).
    out = mlp_model_forward(x, params)
    out = jax.block_until_ready(out)
    assert out.shape == (N, out_dim, H, W), out.shape
    ref = _reference(x, params)
    assert jnp.allclose(out, ref, atol=1e-5, rtol=1e-5)

    # bf16 compute path (v6e/v7x) — smoke test that it runs and is finite.
    out_bf16 = mlp_model_forward(x, params, compute_dtype=jnp.bfloat16)
    out_bf16 = jax.block_until_ready(out_bf16)
    assert out_bf16.shape == (N, out_dim, H, W), out_bf16.shape
    assert bool(jnp.all(jnp.isfinite(out_bf16)))

    print("KERNEL_OK")
</pallas_src>

<mosaic_0001>
module attributes {stable_mosaic.version = 11 : i64} {
  func.func @_mlp_kernel(%arg0: i32, %arg1: i32, %arg2: memref<1x8x64xf32, #tpu.memory_space<vmem>>, %arg3: memref<32x8xf32, #tpu.memory_space<vmem>>, %arg4: memref<32x1xf32, #tpu.memory_space<vmem>>, %arg5: memref<32x32xf32, #tpu.memory_space<vmem>>, %arg6: memref<32x1xf32, #tpu.memory_space<vmem>>, %arg7: memref<8x32xf32, #tpu.memory_space<vmem>>, %arg8: memref<8x1xf32, #tpu.memory_space<vmem>>, %arg9: memref<1x1x64xf32, #tpu.memory_space<vmem>>) attributes {dimension_semantics = [#tpu.dimension_semantics<parallel>, #tpu.dimension_semantics<parallel>], iteration_bounds = array<i64: 2, 1>, scalar_prefetch = 0 : i64, scratch_operands = 0 : i64, tpu.core_type = #tpu.core_type<tc>, window_params = [{transform_indices = @transform_0, window_bounds = array<i64: 1, 8, 64>}, {pipeline_mode = #tpu.pipeline_mode<synchronous>, transform_indices = @transform_1, window_bounds = array<i64: 32, 8>}, {pipeline_mode = #tpu.pipeline_mode<synchronous>, transform_indices = @transform_2, window_bounds = array<i64: 32, 1>}, {pipeline_mode = #tpu.pipeline_mode<synchronous>, transform_indices = @transform_3, window_bounds = array<i64: 32, 32>}, {pipeline_mode = #tpu.pipeline_mode<synchronous>, transform_indices = @transform_4, window_bounds = array<i64: 32, 1>}, {pipeline_mode = #tpu.pipeline_mode<synchronous>, transform_indices = @transform_5, window_bounds = array<i64: 8, 32>}, {pipeline_mode = #tpu.pipeline_mode<synchronous>, transform_indices = @transform_6, window_bounds = array<i64: 8, 1>}, {transform_indices = @transform_7, window_bounds = array<i64: 1, 1, 64>}]} {
    %c0 = arith.constant 0 : index
    %c0_0 = arith.constant 0 : index
    %c0_1 = arith.constant 0 : index
    %0 = vector.load %arg2[%c0, %c0_0, %c0_1] : memref<1x8x64xf32, #tpu.memory_space<vmem>>, vector<1x8x64xf32>
    %1 = vector.shape_cast %0 : vector<1x8x64xf32> to vector<8x64xf32>
    %c0_2 = arith.constant 0 : index
    %c0_3 = arith.constant 0 : index
    %2 = vector.load %arg3[%c0_2, %c0_3] : memref<32x8xf32, #tpu.memory_space<vmem>>, vector<32x8xf32>
    %cst = arith.constant dense<0.000000e+00> : vector<32x64xf32>
    %3 = tpu.matmul %2, %1, %cst {dimension_numbers = #tpu.dot_dimension_numbers<[1], [0], [0], [1], [0, 0, 1, 1], [], []>} : vector<32x8xf32>, vector<8x64xf32>, vector<32x64xf32> -> vector<32x64xf32>
    %c0_4 = arith.constant 0 : index
    %c0_5 = arith.constant 0 : index
    %4 = vector.load %arg4[%c0_4, %c0_5] : memref<32x1xf32, #tpu.memory_space<vmem>>, vector<32x1xf32>
    %5 = vector.broadcast %4 : vector<32x1xf32> to vector<32x64xf32>
    %6 = arith.addf %3, %5 : vector<32x64xf32>
    %cst_6 = arith.constant 0.000000e+00 : f32
    %7 = vector.broadcast %cst_6 : f32 to vector<32x64xf32>
    %8 = arith.maximumf %6, %7 : vector<32x64xf32>
    %c0_7 = arith.constant 0 : index
    %c0_8 = arith.constant 0 : index
    %9 = vector.load %arg5[%c0_7, %c0_8] : memref<32x32xf32, #tpu.memory_space<vmem>>, vector<32x32xf32>
    %cst_9 = arith.constant dense<0.000000e+00> : vector<32x64xf32>
    %10 = tpu.matmul %9, %8, %cst_9 {dimension_numbers = #tpu.dot_dimension_numbers<[1], [0], [0], [1], [0, 0, 1, 1], [], []>} : vector<32x32xf32>, vector<32x64xf32>, vector<32x64xf32> -> vector<32x64xf32>
    %c0_10 = arith.constant 0 : index
    %c0_11 = arith.constant 0 : index
    %11 = vector.load %arg6[%c0_10, %c0_11] : memref<32x1xf32, #tpu.memory_space<vmem>>, vector<32x1xf32>
    %12 = vector.broadcast %11 : vector<32x1xf32> to vector<32x64xf32>
    %13 = arith.addf %10, %12 : vector<32x64xf32>
    %cst_12 = arith.constant 0.000000e+00 : f32
    %14 = vector.broadcast %cst_12 : f32 to vector<32x64xf32>
    %15 = arith.maximumf %13, %14 : vector<32x64xf32>
    %c0_13 = arith.constant 0 : index
    %c0_14 = arith.constant 0 : index
    %16 = vector.load %arg7[%c0_13, %c0_14] : memref<8x32xf32, #tpu.memory_space<vmem>>, vector<8x32xf32>
    %cst_15 = arith.constant dense<0.000000e+00> : vector<8x64xf32>
    %17 = tpu.matmul %16, %15, %cst_15 {dimension_numbers = #tpu.dot_dimension_numbers<[1], [0], [0], [1], [0, 0, 1, 1], [], []>} : vector<8x32xf32>, vector<32x64xf32>, vector<8x64xf32> -> vector<8x64xf32>
    %c0_16 = arith.constant 0 : index
    %c0_17 = arith.constant 0 : index
    %18 = vector.load %arg8[%c0_16, %c0_17] : memref<8x1xf32, #tpu.memory_space<vmem>>, vector<8x1xf32>
    %19 = vector.broadcast %18 : vector<8x1xf32> to vector<8x64xf32>
    %20 = arith.addf %17, %19 : vector<8x64xf32>
    %21 = vector.extract_strided_slice %20 {offsets = [0, 0], sizes = [1, 64], strides = [1, 1]} : vector<8x64xf32> to vector<1x64xf32>
    %c0_18 = arith.constant 0 : index
    %c0_19 = arith.constant 0 : index
    %c0_20 = arith.constant 0 : index
    %22 = vector.load %arg9[%c0_18, %c0_19, %c0_20] : memref<1x1x64xf32, #tpu.memory_space<vmem>>, vector<1x1x64xf32>
    %23 = vector.shape_cast %22 : vector<1x1x64xf32> to vector<1x64xf32>
    %24 = vector.shape_cast %21 : vector<1x64xf32> to vector<1x1x64xf32>
    tpu.vector_store %arg9[%c0_18, %c0_19, %c0_20], %24 {strides = array<i32>} : memref<1x1x64xf32, #tpu.memory_space<vmem>>, vector<1x1x64xf32>,
    return
  }
  func.func @transform_0(%arg0: i32, %arg1: i32) -> (i32, i32, i32) {
    %c0_i32 = arith.constant 0 : i32
    %c0_i32_0 = arith.constant 0 : i32
    return %arg0, %c0_i32, %arg1 : i32, i32, i32
  }
  func.func @transform_1(%arg0: i32, %arg1: i32) -> (i32, i32) {
    %c0_i32 = arith.constant 0 : i32
    %c0_i32_0 = arith.constant 0 : i32
    %c0_i32_1 = arith.constant 0 : i32
    return %c0_i32, %c0_i32_0 : i32, i32
  }
  func.func @transform_2(%arg0: i32, %arg1: i32) -> (i32, i32) {
    %c0_i32 = arith.constant 0 : i32
    %c0_i32_0 = arith.constant 0 : i32
    %c0_i32_1 = arith.constant 0 : i32
    return %c0_i32, %c0_i32_0 : i32, i32
  }
  func.func @transform_3(%arg0: i32, %arg1: i32) -> (i32, i32) {
    %c0_i32 = arith.constant 0 : i32
    %c0_i32_0 = arith.constant 0 : i32
    %c0_i32_1 = arith.constant 0 : i32
    return %c0_i32, %c0_i32_0 : i32, i32
  }
  func.func @transform_4(%arg0: i32, %arg1: i32) -> (i32, i32) {
    %c0_i32 = arith.constant 0 : i32
    %c0_i32_0 = arith.constant 0 : i32
    %c0_i32_1 = arith.constant 0 : i32
    return %c0_i32, %c0_i32_0 : i32, i32
  }
  func.func @transform_5(%arg0: i32, %arg1: i32) -> (i32, i32) {
    %c0_i32 = arith.constant 0 : i32
    %c0_i32_0 = arith.constant 0 : i32
    %c0_i32_1 = arith.constant 0 : i32
    return %c0_i32, %c0_i32_0 : i32, i32
  }
  func.func @transform_6(%arg0: i32, %arg1: i32) -> (i32, i32) {
    %c0_i32 = arith.constant 0 : i32
    %c0_i32_0 = arith.constant 0 : i32
    %c0_i32_1 = arith.constant 0 : i32
    return %c0_i32, %c0_i32_0 : i32, i32
  }
  func.func @transform_7(%arg0: i32, %arg1: i32) -> (i32, i32, i32) {
    %c0_i32 = arith.constant 0 : i32
    %c0_i32_0 = arith.constant 0 : i32
    return %arg0, %c0_i32, %arg1 : i32, i32, i32
  }
}

</mosaic_0001>

<bundles_post_ra>
// kernel: mlp_model_forward.1
= control target key start
LH: loop header
LB: loop body
LE: loop exit
PB: predicated region body
PF: predicated region fallthrough
CT: control target
= control target key end

     0   :  { %s894_s24 = smov 0   ;;  %s896_s25 = smov 0   ;;  %s994_s0 = inlined_call_operand.vmem [shape: f32[2,8,64], index: 0, kind: input, shape index: {}]   ;;  %s995_s1 = inlined_call_operand.vmem [shape: f32[32,8], index: 1, kind: input, shape index: {}]   ;;  %s996_s2 = inlined_call_operand.vmem [shape: f32[32,1], index: 2, kind: input, shape index: {}]   ;;  %s997_s3 = inlined_call_operand.vmem [shape: f32[32,32], index: 3, kind: input, shape index: {}]   ;;  %s998_s4 = inlined_call_operand.vmem [shape: f32[32,1], index: 4, kind: input, shape index: {}]   ;;  %s999_s5 = inlined_call_operand.vmem [shape: f32[8,32], index: 5, kind: input, shape index: {}]   ;;  %s1000_s6 = inlined_call_operand.vmem [shape: f32[8,1], index: 6, kind: input, shape index: {}]   ;;  %s1001_s7 = inlined_call_operand.vmem [shape: f32[2,1,64], index: 7, kind: output, shape index: {}]  }
   0x1   :  { %s898_s26 = smov 0  }
   0x2 LB: > { %s29_s27 = sadd.s32 1, %s844_s25  ;;  %p718_p0 = scmp.ge.s32.totalorder %s848_s26, 1  ;;  %s848_s26 = sphi %s898_s26, %s17_s26   ;;  %s844_s25 = sphi %s896_s25, %s1003_s25   ;;  %s840_s24 = sphi %s894_s24, %s1002_s24  }
   0x3   : > { %p31_p1 = scmp.ge.s32.totalorder %s29_s27, 2  ;;  %p255_p2 = scmp.lt.s32.totalorder %s848_s26, 3 }
   0x5   : > { %s1005_s27 = smov (%p31_p1, %s29_s27), 0  ;;  %p256_p3 = pnand %p718_p0, %p255_p2 }
   0x6   : > { %p290_p4 = scmp.lt.s32.totalorder (!%p256_p3), %s840_s24, 1  ;;  %v304_v0 = vld [vmem:[%s995_s1] sm:$0xff] (!%p256_p3)  ;;  %vm332_vm0 = vcmask (!%p256_p3), 64512   ;;  %v850_v1 = vmov (!%p256_p3), 0   ;;  %v310_v3 = vld [vmem:[%s996_s2 + $0x10] sm:$0xff] (!%p256_p3)  ;;  %v309_v4 = vld [vmem:[%s996_s2 + $0x8] sm:$0xff] (!%p256_p3) }
   0x7   : > { %259 = sbr.rel (%p256_p3) target bundleno = 688 (0x2b0), region = 48  ;;  %751 = vmatprep.mubr.msk.f32.mxu0 (!%p256_p3), %vm332_vm0, %v304_v0  ;;  %824 = vset.pattern.permute.xlu0 (!%p256_p3), %v850_v1  ;;  %v308_v2 = vld [vmem:[%s996_s2] sm:$0xff] (!%p256_p3)  ;;  %v311_v5 = vld [vmem:[%s996_s2 + $0x18] sm:$0xff] (!%p256_p3)  ;;  %v305_v7 = vld [vmem:[%s995_s1 + $0x8] sm:$0xff] (!%p256_p3)  ;;  %vm462_vm1 = vcmask (!%p256_p3), 261120   ;;  %v851_v37 = vmov (!%p256_p3), 0.0|0.0  }
   0x8   : > { %314 = vperm.xlu0 (!%p256_p3), %824, %v308_v2   ;;  %825 = vset.pattern.permute.xlu1 (!%p256_p3), %v850_v1  ;;  %v306_v8 = vld [vmem:[%s995_s1 + $0x10] sm:$0xff] (!%p256_p3)  ;;  %v438_v9 = vld [vmem:[%s998_s4] sm:$0xff] (!%p256_p3)  ;;  %v439_v10 = vld [vmem:[%s998_s4 + $0x8] sm:$0xff] (!%p256_p3)  ;;  %vm852_vm2 = vmmov (!%p256_p3), 0   ;;  %v853_v38 = vmov (!%p256_p3), 0.0   ;;  %vm644_vm3 = vcmask (!%p256_p3), 516096  }
   0x9   : > { %324 = vperm.xlu1 (!%p256_p3), %825, %v310_v3   ;;  %v307_v11 = vld [vmem:[%s995_s1 + $0x18] sm:$0xff] (!%p256_p3)  ;;  %v440_v12 = vld [vmem:[%s998_s4 + $0x10] sm:$0xff] (!%p256_p3)  ;;  %v565_v14 = vld [vmem:[%s1000_s6] sm:$0xff] (!%p256_p3) }
   0xa   : > { %v441_v13 = vld [vmem:[%s998_s4 + $0x18] sm:$0xff] (!%p256_p3)  ;;  %v434_v15 = vld [vmem:[%s997_s3] sm:$0xff] (!%p256_p3)  ;;  %v435_v34 = vld [vmem:[%s997_s3 + $0x8] sm:$0xff] (!%p256_p3) }
   0xb   : > { %765 = vmatprep.mubr.msk.f32.mxu1 (!%p256_p3), %vm462_vm1, %v434_v15  ;;  %v436_v35 = vld [vmem:[%s997_s3 + $0x10] sm:$0xff] (!%p256_p3)  ;;  %v437_v36 = vld [vmem:[%s997_s3 + $0x18] sm:$0xff] (!%p256_p3)  ;;  %v564_v57 = vld [vmem:[%s999_s5] sm:$0xff] (!%p256_p3) }
   0xc   : > { %319 = vperm.xlu0 (!%p256_p3), %824, %v309_v4  }
   0xd   : > { %329 = vperm.xlu1 (!%p256_p3), %825, %v311_v5  }
   0xe   : > { %s1007_s24 = smov (!%p290_p4, %s840_s24), 1 }
   0xf   : > { %s719_s13 = sshll.u32 %s1007_s24, 3  ;;  %s302_s9 = scalar_lea.vmem %s1001_s7, %s1007_s24 }
  0x10   : > { %s296_s18 = scalar_lea.vmem %s994_s0, %s719_s13  ;;  %444 = vperm.xlu0 %824, %v438_v9  }
  0x11   : > { %v303_v6 = vld [vmem:[%s296_s18] sm:$0xff]  ;;  %449 = vperm.xlu1 %825, %v439_v10  }
  0x12   : > { %749 = vmatprep.subr.mxu0 %v303_v6 }
  0x13   : > { %750 = vmatpush3.msra.mxu0 %v303_v6 }
  0x14   : > { %752 = vmatmul.mubr.msk.f32.vlgmr.msra.gmra.mrb[0].mxu0 %vm332_vm0, %v305_v7  ;;  %454 = vperm.xlu0 %824, %v440_v12  }
  0x15   : > { %754 = vmatprep.mubr.msk.f32.mxu0 %vm332_vm0, %v306_v8  ;;  %459 = vperm.xlu1 %825, %v441_v13  }
  0x16   : > { %790 = vmatprep.subr.bf16.mxu0 %v851_v37 }
  0x18   : > { %755 = vmatmul.mubr.msk.f32.gmra.mrb[2].mxu0 %vm332_vm0, %v307_v11  ;;  %568 = vperm.xlu0 %824, %v565_v14  }
  0x19   : > { %779 = vmatprep.mubr.msk.f32.mxu0 %vm852_vm2, %v853_v38 }
  0x87   : > { %v315_v16 = vpop.permute.xlu0 %314 }
  0x88   : > { %v325_v17 = vpop.permute.xlu1 %324 }
  0x8b   : > { %v320_v18 = vpop.permute.xlu0 %319 }
  0x8c   : > { %v330_v24 = vpop.permute.xlu1 %329 }
  0x8f   : > { %v445_v40 = vpop.permute.xlu0 %444 }
  0x90   : > { %v450_v39 = vpop.permute.xlu1 %449 }
  0x93   : > { %v455_v49 = vpop.permute.xlu0 %454 }
  0x94   : > { %v460_v46 = vpop.permute.xlu1 %459 }
  0x97   : > { %v569_v58 = vpop.permute.xlu0 %568 }
  0xe7   : > { %v753_v19 = vpop.f32.mrb[0].mxu0 }
  0xe8   : > { %v417_v20 = vadd.f32 %v753_v19, %v320_v18  ;;  %v411_v21 = vpop.f32.mrb[1].mxu0 }
  0xe9   : > { %v412_v22 = vadd.f32 %v411_v21, %v315_v16 }
  0xea   : > { %v431_v23 = vmax.f32 %v417_v20, 0.0 }
  0xeb   : > { %v430_v25 = vmax.f32 %v412_v22, 0.0  ;;  %v756_v26 = vpop.f32.mrb[2].mxu0 }
  0xec   : > { %v427_v27 = vadd.f32 %v756_v26, %v330_v24  ;;  %v421_v28 = vpop.f32.mrb[3].mxu0 }
  0xed   : > { %v422_v29 = vadd.f32 %v421_v28, %v325_v17  ;;  %v782_v30 = vpack.c.bf16 %v431_v23, %v430_v25 }
  0xee   : > { %v433_v31 = vmax.f32 %v427_v27, 0.0 }
  0xef   : > { %v432_v32 = vmax.f32 %v422_v29, 0.0  ;;  %783 = vmatprep.subr.bf16.mxu1 %v782_v30 }
  0xf0   : > { %785 = vmatpush3.bf16.msra.mxu1 %v782_v30 }
  0xf1   : > { %v786_v33 = vpack.c.bf16 %v433_v31, %v432_v32 }
  0xf3   : > { %787 = vmatprep.subr.bf16.mxu1 %v786_v33 }
  0xf4   : > { %789 = vmatpush3.bf16.msra.mxu1 %v786_v33 }
  0xf7   : > { %766 = vmatmul.mubr.msk.f32.vlgmr.msra.gmra.mrb[0].mxu1 %vm462_vm1, %v435_v34 }
  0xf8   : > { %768 = vmatprep.mubr.msk.f32.mxu1 %vm462_vm1, %v436_v35 }
  0xfb   : > { %769 = vmatmul.mubr.msk.f32.gmra.mrb[2].mxu1 %vm462_vm1, %v437_v36 }
 0x1ca   : > { %v767_v41 = vpop.f32.mrb[0].mxu1 }
 0x1cb   : > { %v547_v42 = vadd.f32 %v767_v41, %v450_v39  ;;  %v541_v43 = vpop.f32.mrb[1].mxu1 }
 0x1cc   : > { %v542_v44 = vadd.f32 %v541_v43, %v445_v40 }
 0x1cd   : > { %v561_v45 = vmax.f32 %v547_v42, 0.0 }
 0x1ce   : > { %v560_v47 = vmax.f32 %v542_v44, 0.0  ;;  %v770_v48 = vpop.f32.mrb[2].mxu1 }
 0x1cf   : > { %v557_v50 = vadd.f32 %v770_v48, %v460_v46  ;;  %v551_v51 = vpop.f32.mrb[3].mxu1 }
 0x1d0   : > { %v791_v52 = vpack.c.bf16 %v561_v45, %v560_v47  ;;  %v552_v53 = vadd.f32 %v551_v51, %v455_v49 }
 0x1d1   : > { %v563_v54 = vmax.f32 %v557_v50, 0.0 }
 0x1d2   : > { %v562_v55 = vmax.f32 %v552_v53, 0.0  ;;  %792 = vmatpush3.bf16.msra.mxu0 %v791_v52 }
 0x1d3   : > { %793 = vmatprep.subr.bf16.mxu0 %v851_v37 }
 0x1d4   : > { %v794_v56 = vpack.c.bf16 %v563_v54, %v562_v55 }
 0x1d6   : > { %795 = vmatpush3.bf16.msra.mxu0 %v794_v56 }
 0x1d9   : > { %780 = vmatmul.mubr.msk.f32.vlgmr.msra.gmra.mrb[4].mxu0 %vm462_vm1, %v564_v57 }
 0x2ac   : > { %v640_v59 = vpop.f32.mrb[4].mxu0 }
 0x2ad   : > { %v641_v60 = vadd.f32 %v640_v59, %v569_v58  ;;  %v781_v61 = vpop.f32.mrb[5].mxu0 }
 0x2af   : > { %645 = vst.msk [vmem:[%s302_s9] sm:$0x1] %vm644_vm3, %v641_v60 }
 0x2b0 PF: > { %s17_s26 = sadd.s32 1, %s848_s26   ;;  %s1002_s24 = smov %s844_s25 }
 0x2b1   : > { %p14_p5 = scmp.ge.s32.totalorder %s17_s26, 4   ;;  %s1003_s25 = smov %s1005_s27 }
 0x2b3   :  { %16 = sbr.rel (!%p14_p5) target bundleno = 2 (0x2), region = 78 }

</bundles_post_ra>
